<compile_context>
chip_gen: v6e
topology: v6e:2x2x1
jax: 0.10.0
libtpu: 0.0.40
codegen_flags: <defaults>
</compile_context>

<pallas_src>
from functools import partial

import numpy as np
import jax
import jax.numpy as jnp
from jax.experimental import pallas as pl
from jax.experimental.pallas import tpu as pltpu


def aggregator_kernel(self_agg_ref, self_ff_ref, embed_ref, mask_ref,
                      wv_ref, wff_ref, wmu_self_ref, wmu_neigh_ref,
                      out_ref, *, dout, mxu_dtype, approx_recip):
    f32 = jnp.float32
    md = mxu_dtype

    x_self = self_agg_ref[...]                      # [TB, Din]
    x_ff = self_ff_ref[...]                         # [TB, Din]
    x_nb = embed_ref[...]                           # [U,  Din]
    wv = wv_ref[...]                                # [Din, Dout]
    wff = wff_ref[...]                              # [Din, Dout]

    # ---- MXU: three well-shaped matmuls, f32 accumulation -------------------
    self_v = jnp.dot(x_self.astype(md), wv.astype(md),
                     preferred_element_type=f32)    # [TB, Dout]
    embed_v = jnp.dot(x_nb.astype(md), wv.astype(md),
                      preferred_element_type=f32)   # [U, Dout]
    ff = jnp.dot(x_ff.astype(md), wff.astype(md),
                 preferred_element_type=f32)        # [TB, Dout]

    c, tb, u = mask_ref.shape
    mask = mask_ref[...]                            # [C, TB, U] 0/1 (bf16)
    mask2d = mask.astype(md).reshape(c * tb, u)
    # One batched matmul for ALL persona clusters (raw mask; normalize after).
    n_raw = jnp.dot(mask2d, embed_v.astype(md),
                    preferred_element_type=f32).reshape(c, tb, dout)

    # ---- VPU / XLU / EUP -----------------------------------------------------
    wmu_self_row = wmu_self_ref[...].astype(f32)    # [1, Dout]
    wmu_neigh_row = wmu_neigh_ref[...].astype(f32)  # [1, Dout]

    mu_self = jnp.sum(self_v * wmu_self_row, axis=-1, keepdims=True)   # [TB,1]
    self_sq = jnp.sum(self_v * self_v, axis=-1, keepdims=True)         # [TB,1]

    cnt = jnp.sum(mask.astype(f32), axis=-1, keepdims=True)            # [C,TB,1]
    cnt = jnp.where(cnt == 0.0, 1.0, cnt)           # num_neigh[num_neigh==0]=1
    if approx_recip:
        inv_cnt = pl.reciprocal(cnt, approx=True)
    else:
        inv_cnt = 1.0 / cnt
    neigh = n_raw * inv_cnt                         # mean aggregation [C,TB,Dout]

    mu_neigh = jnp.sum(neigh * wmu_neigh_row, axis=-1, keepdims=True)  # [C,TB,1]
    neigh_sq = jnp.sum(neigh * neigh, axis=-1, keepdims=True)          # [C,TB,1]

    # F.normalize(cat(self, neigh), dim=-1) followed by mu(...): one EUP rsqrt.
    logits = (mu_self[None] + mu_neigh) * jax.lax.rsqrt(
        jnp.maximum(self_sq[None] + neigh_sq, 1e-24))                  # [C,TB,1]

    # Softmax over the cluster axis (axis 0).
    m_max = jnp.max(logits, axis=0, keepdims=True)
    e = jnp.exp(logits - m_max)
    denom = jnp.sum(e, axis=0, keepdims=True)
    if approx_recip:
        inv_denom = pl.reciprocal(denom, approx=True)
    else:
        inv_denom = 1.0 / denom
    attn = e * inv_denom

    neigh_sum = jnp.sum(neigh * attn, axis=0)                          # [TB,Dout]
    agg = (self_v + neigh_sum) * 0.5

    # Fused lane-dense output slab [TB, 2*Dout]; ELU with overflow-safe exp.
    def elu(v):
        return jnp.where(v > 0.0, v, jnp.exp(jnp.minimum(v, 0.0)) - 1.0)

    out_ref[:, :dout] = elu(agg)
    out_ref[:, dout:] = elu(ff)


def aggregator_forward(self_agg, self_ff, embed, mask_bcu, wv, wff, wmu,
                       *, tb=None, precise=True):
    """mask_bcu: [B, C, U] binary cluster-membership mask (PyTorch layout)."""
    B, din = self_agg.shape
    dout = wv.shape[1]
    C, U = mask_bcu.shape[1], mask_bcu.shape[2]

    # Cluster-major mask in a narrow dtype (0/1 is exact in bf16): [C, B, U].
    mask_cbu = jnp.transpose(mask_bcu, (1, 0, 2)).astype(jnp.bfloat16)

    # mu weight split into lane-dense row vectors [1, Dout].
    wmu_self_row = jnp.reshape(wmu[:dout, 0], (1, dout)).astype(jnp.float32)
    wmu_neigh_row = jnp.reshape(wmu[dout:, 0], (1, dout)).astype(jnp.float32)

    # Batch tile: multiple of 16 (bf16 sublane packing of the mask), <= 128.
    if tb is None:
        tb = min(128, ((B + 15) // 16) * 16)
    tb = max(16, (tb // 16) * 16)
    b_pad = ((B + tb - 1) // tb) * tb
    if b_pad != B:
        self_agg = jnp.pad(self_agg, ((0, b_pad - B), (0, 0)))
        self_ff = jnp.pad(self_ff, ((0, b_pad - B), (0, 0)))
        mask_cbu = jnp.pad(mask_cbu, ((0, 0), (0, b_pad - B), (0, 0)))

    mxu_dtype = jnp.float32 if precise else jnp.bfloat16
    kernel = partial(aggregator_kernel, dout=dout,
                     mxu_dtype=mxu_dtype, approx_recip=not precise)

    out = pl.pallas_call(
        kernel,
        out_shape=jax.ShapeDtypeStruct((b_pad, 2 * dout), jnp.float32),
        grid=(b_pad // tb,),
        in_specs=[
            pl.BlockSpec((tb, din), lambda i: (i, 0)),       # self_agg (tiled B)
            pl.BlockSpec((tb, din), lambda i: (i, 0)),       # self_ff  (tiled B)
            pl.BlockSpec((U, din), lambda i: (0, 0)),        # embed    (resident)
            pl.BlockSpec((C, tb, U), lambda i: (0, i, 0)),   # mask     (tiled B)
            pl.BlockSpec((din, dout), lambda i: (0, 0)),     # wv       (resident)
            pl.BlockSpec((din, dout), lambda i: (0, 0)),     # wff      (resident)
            pl.BlockSpec((1, dout), lambda i: (0, 0)),       # wmu_self row
            pl.BlockSpec((1, dout), lambda i: (0, 0)),       # wmu_neigh row
        ],
        out_specs=pl.BlockSpec((tb, 2 * dout), lambda i: (i, 0)),
        compiler_params=pltpu.CompilerParams(
            dimension_semantics=("parallel",),
            vmem_limit_bytes=32 * 1024 * 1024),
    )(self_agg, self_ff, embed, mask_cbu, wv, wff, wmu_self_row, wmu_neigh_row)

    out = out[:B]
    return out[:, :dout], out[:, dout:]


def reference_forward(self_agg, self_ff, embed, mask_bcu, wv, wff, wmu):
    """Pure-JAX mirror of the PyTorch forward (for verification)."""
    self_v = self_agg @ wv
    embed_v = embed @ wv
    num = mask_bcu.sum(-1, keepdims=True)
    num = jnp.where(num == 0.0, 1.0, num)
    maskn = mask_bcu / num
    neigh = jnp.einsum('bcu,ud->bcd', maskn, embed_v)
    coef = jnp.concatenate(
        [jnp.broadcast_to(self_v[:, None, :], neigh.shape), neigh], axis=-1)
    norm = jnp.maximum(jnp.linalg.norm(coef, axis=-1, keepdims=True), 1e-12)
    logits = (coef / norm) @ wmu                      # [B, C, 1]
    attn = jax.nn.softmax(logits, axis=1)
    neigh_sum = jnp.sum(neigh * attn, axis=1)
    agg = (self_v + neigh_sum) / 2.0
    ff = self_ff @ wff
    elu = lambda x: jnp.where(x > 0, x, jnp.exp(x) - 1.0)
    return elu(agg), elu(ff)


if __name__ == "__main__":
    # ----- small deterministic problem -----
    num_nodes_total = 20
    B = 8            # batch of query nodes
    Din, Dout = 32, 32
    C = 3            # max_cluster

    key = jax.random.PRNGKey(0)
    k1, k2, k3, k4, k5 = jax.random.split(key, 5)

    # "features(nodes)" returns (agg_attr, ff_attr): two embedding tables.
    feat_agg_table = jax.random.normal(k1, (num_nodes_total, Din), jnp.float32)
    feat_ff_table = jax.random.normal(k2, (num_nodes_total, Din), jnp.float32)

    # nn.Linear weights, stored transposed as [in, out] so y = x @ W
    def linear_init(k, fan_in, fan_out):
        bound = 1.0 / np.sqrt(fan_in)
        return jax.random.uniform(k, (fan_in, fan_out), jnp.float32, -bound, bound)

    wv = linear_init(k3, Din, Dout)          # agg_weight_v
    wff = linear_init(k4, Din, Dout)         # ff_weight_v
    wmu = linear_init(k5, 2 * Dout, 1)       # mu
    # TODO(synk): weight_k / weight_q (K, Q) are dead code in the reference
    # forward (computed, never used) and are intentionally not materialized.

    # Deterministic synthetic clustering_adj: per node, C clusters of neighbors
    # (some empty to exercise the num_neigh==0 path).
    nodes = list(range(B))
    clustering_adj = {}
    for n in nodes:
        clusters = []
        for c in range(C):
            size = (n + c) % 3
            clusters.append([(n * 3 + c * 5 + j) % num_nodes_total
                             for j in range(size)])
        clustering_adj[n] = clusters

    to_neighs = [set(x for cl in clustering_adj[n] for x in cl) for n in nodes]
    unique_nodes_list = sorted(set().union(*to_neighs))
    unique_nodes = {n: i for i, n in enumerate(unique_nodes_list)}
    U = len(unique_nodes_list)

    # Binary membership mask, torch layout [B, C, U]
    mask_np = np.zeros((B, C, U), dtype=np.float32)
    for i, n in enumerate(nodes):
        for c, cluster in enumerate(clustering_adj[n]):
            for nb in cluster:
                mask_np[i, c, unique_nodes[nb]] = 1.0
    mask_bcu = jnp.asarray(mask_np)

    self_agg = feat_agg_table[jnp.asarray(nodes)]
    self_ff = feat_ff_table[jnp.asarray(nodes)]
    embed = feat_agg_table[jnp.asarray(unique_nodes_list)]

    ref_agg, ref_ff = reference_forward(
        self_agg, self_ff, embed, mask_bcu, wv, wff, wmu)

    # ---- precise path (f32 MXU operands, exact reciprocals) ----
    out_agg, out_ff = aggregator_forward(
        self_agg, self_ff, embed, mask_bcu, wv, wff, wmu, precise=True)
    jax.block_until_ready((out_agg, out_ff))
    np.testing.assert_allclose(np.asarray(out_agg), np.asarray(ref_agg),
                               rtol=1e-4, atol=1e-4)
    np.testing.assert_allclose(np.asarray(out_ff), np.asarray(ref_ff),
                               rtol=1e-4, atol=1e-4)

    # ---- fast path (bf16 MXU operands + approx EUP reciprocals) ----
    fst_agg, fst_ff = aggregator_forward(
        self_agg, self_ff, embed, mask_bcu, wv, wff, wmu, precise=False)
    jax.block_until_ready((fst_agg, fst_ff))
    np.testing.assert_allclose(np.asarray(fst_agg), np.asarray(ref_agg),
                               rtol=5e-2, atol=5e-2)
    np.testing.assert_allclose(np.asarray(fst_ff), np.asarray(ref_ff),
                               rtol=5e-2, atol=5e-2)

    print("KERNEL_OK")
</pallas_src>

<mosaic_0001>
module attributes {stable_mosaic.version = 11 : i64} {
  func.func @aggregator_kernel(%arg0: i32, %arg1: memref<16x32xf32, #tpu.memory_space<vmem>>, %arg2: memref<16x32xf32, #tpu.memory_space<vmem>>, %arg3: memref<17x32xf32, #tpu.memory_space<vmem>>, %arg4: memref<3x16x17xbf16, #tpu.memory_space<vmem>>, %arg5: memref<32x32xf32, #tpu.memory_space<vmem>>, %arg6: memref<32x32xf32, #tpu.memory_space<vmem>>, %arg7: memref<1x32xf32, #tpu.memory_space<vmem>>, %arg8: memref<1x32xf32, #tpu.memory_space<vmem>>, %arg9: memref<16x64xf32, #tpu.memory_space<vmem>>) attributes {dimension_semantics = [#tpu.dimension_semantics<parallel>], iteration_bounds = array<i64: 1>, scalar_prefetch = 0 : i64, scratch_operands = 0 : i64, tpu.core_type = #tpu.core_type<tc>, window_params = [{transform_indices = @transform_0, window_bounds = array<i64: 16, 32>}, {transform_indices = @transform_1, window_bounds = array<i64: 16, 32>}, {pipeline_mode = #tpu.pipeline_mode<synchronous>, transform_indices = @transform_2, window_bounds = array<i64: 17, 32>}, {transform_indices = @transform_3, window_bounds = array<i64: 3, 16, 17>}, {pipeline_mode = #tpu.pipeline_mode<synchronous>, transform_indices = @transform_4, window_bounds = array<i64: 32, 32>}, {pipeline_mode = #tpu.pipeline_mode<synchronous>, transform_indices = @transform_5, window_bounds = array<i64: 32, 32>}, {pipeline_mode = #tpu.pipeline_mode<synchronous>, transform_indices = @transform_6, window_bounds = array<i64: 1, 32>}, {pipeline_mode = #tpu.pipeline_mode<synchronous>, transform_indices = @transform_7, window_bounds = array<i64: 1, 32>}, {transform_indices = @transform_8, window_bounds = array<i64: 16, 64>}]} {
    %c0 = arith.constant 0 : index
    %c0_0 = arith.constant 0 : index
    %0 = vector.load %arg1[%c0, %c0_0] : memref<16x32xf32, #tpu.memory_space<vmem>>, vector<16x32xf32>
    %c0_1 = arith.constant 0 : index
    %c0_2 = arith.constant 0 : index
    %1 = vector.load %arg2[%c0_1, %c0_2] : memref<16x32xf32, #tpu.memory_space<vmem>>, vector<16x32xf32>
    %c0_3 = arith.constant 0 : index
    %c0_4 = arith.constant 0 : index
    %2 = vector.load %arg3[%c0_3, %c0_4] : memref<17x32xf32, #tpu.memory_space<vmem>>, vector<17x32xf32>
    %c0_5 = arith.constant 0 : index
    %c0_6 = arith.constant 0 : index
    %3 = vector.load %arg5[%c0_5, %c0_6] : memref<32x32xf32, #tpu.memory_space<vmem>>, vector<32x32xf32>
    %c0_7 = arith.constant 0 : index
    %c0_8 = arith.constant 0 : index
    %4 = vector.load %arg6[%c0_7, %c0_8] : memref<32x32xf32, #tpu.memory_space<vmem>>, vector<32x32xf32>
    %cst = arith.constant dense<0.000000e+00> : vector<16x32xf32>
    %5 = tpu.matmul %0, %3, %cst {dimension_numbers = #tpu.dot_dimension_numbers<[1], [0], [0], [1], [0, 0, 1, 1], [], []>} : vector<16x32xf32>, vector<32x32xf32>, vector<16x32xf32> -> vector<16x32xf32>
    %cst_9 = arith.constant dense<0.000000e+00> : vector<17x32xf32>
    %6 = tpu.matmul %2, %3, %cst_9 {dimension_numbers = #tpu.dot_dimension_numbers<[1], [0], [0], [1], [0, 0, 1, 1], [], []>} : vector<17x32xf32>, vector<32x32xf32>, vector<17x32xf32> -> vector<17x32xf32>
    %cst_10 = arith.constant dense<0.000000e+00> : vector<16x32xf32>
    %7 = tpu.matmul %1, %4, %cst_10 {dimension_numbers = #tpu.dot_dimension_numbers<[1], [0], [0], [1], [0, 0, 1, 1], [], []>} : vector<16x32xf32>, vector<32x32xf32>, vector<16x32xf32> -> vector<16x32xf32>
    %c0_11 = arith.constant 0 : index
    %c0_12 = arith.constant 0 : index
    %c0_13 = arith.constant 0 : index
    %8 = vector.load %arg4[%c0_11, %c0_12, %c0_13] : memref<3x16x17xbf16, #tpu.memory_space<vmem>>, vector<3x16x17xbf16>
    %9 = arith.extf %8 : vector<3x16x17xbf16> to vector<3x16x17xf32>
    %10 = vector.shape_cast %9 : vector<3x16x17xf32> to vector<48x17xf32>
    %cst_14 = arith.constant dense<0.000000e+00> : vector<48x32xf32>
    %11 = tpu.matmul %10, %6, %cst_14 {dimension_numbers = #tpu.dot_dimension_numbers<[1], [0], [0], [1], [0, 0, 1, 1], [], []>} : vector<48x17xf32>, vector<17x32xf32>, vector<48x32xf32> -> vector<48x32xf32>
    %12 = vector.shape_cast %11 : vector<48x32xf32> to vector<3x16x32xf32>
    %c0_15 = arith.constant 0 : index
    %c0_16 = arith.constant 0 : index
    %13 = vector.load %arg7[%c0_15, %c0_16] : memref<1x32xf32, #tpu.memory_space<vmem>>, vector<1x32xf32>
    %c0_17 = arith.constant 0 : index
    %c0_18 = arith.constant 0 : index
    %14 = vector.load %arg8[%c0_17, %c0_18] : memref<1x32xf32, #tpu.memory_space<vmem>>, vector<1x32xf32>
    %15 = vector.broadcast %13 : vector<1x32xf32> to vector<16x32xf32>
    %16 = arith.mulf %5, %15 : vector<16x32xf32>
    %cst_19 = arith.constant dense<0.000000e+00> : vector<16xf32>
    %17 = vector.multi_reduction <add>, %16, %cst_19 [1] : vector<16x32xf32> to vector<16xf32>
    %18 = vector.shape_cast %17 : vector<16xf32> to vector<16x1xf32>
    %19 = arith.mulf %5, %5 : vector<16x32xf32>
    %cst_20 = arith.constant dense<0.000000e+00> : vector<16xf32>
    %20 = vector.multi_reduction <add>, %19, %cst_20 [1] : vector<16x32xf32> to vector<16xf32>
    %21 = vector.shape_cast %20 : vector<16xf32> to vector<16x1xf32>
    %22 = arith.extf %8 : vector<3x16x17xbf16> to vector<3x16x17xf32>
    %cst_21 = arith.constant dense<0.000000e+00> : vector<3x16xf32>
    %23 = vector.multi_reduction <add>, %22, %cst_21 [2] : vector<3x16x17xf32> to vector<3x16xf32>
    %24 = vector.shape_cast %23 : vector<3x16xf32> to vector<3x16x1xf32>
    %cst_22 = arith.constant 0.000000e+00 : f32
    %25 = vector.broadcast %cst_22 : f32 to vector<3x16x1xf32>
    %26 = arith.cmpf oeq, %24, %25 : vector<3x16x1xf32>
    %cst_23 = arith.constant 1.000000e+00 : f32
    %27 = vector.broadcast %cst_23 : f32 to vector<3x16x1xf32>
    %28 = arith.select %26, %27, %24 : vector<3x16x1xi1>, vector<3x16x1xf32>
    %cst_24 = arith.constant 1.000000e+00 : f32
    %29 = vector.broadcast %cst_24 : f32 to vector<3x16x1xf32>
    %30 = arith.divf %29, %28 : vector<3x16x1xf32>
    %31 = vector.broadcast %30 : vector<3x16x1xf32> to vector<3x16x32xf32>
    %32 = arith.mulf %12, %31 : vector<3x16x32xf32>
    %33 = vector.shape_cast %14 : vector<1x32xf32> to vector<1x1x32xf32>
    %34 = vector.broadcast %33 : vector<1x1x32xf32> to vector<3x16x32xf32>
    %35 = arith.mulf %32, %34 : vector<3x16x32xf32>
    %cst_25 = arith.constant dense<0.000000e+00> : vector<3x16xf32>
    %36 = vector.multi_reduction <add>, %35, %cst_25 [2] : vector<3x16x32xf32> to vector<3x16xf32>
    %37 = vector.shape_cast %36 : vector<3x16xf32> to vector<3x16x1xf32>
    %38 = arith.mulf %32, %32 : vector<3x16x32xf32>
    %cst_26 = arith.constant dense<0.000000e+00> : vector<3x16xf32>
    %39 = vector.multi_reduction <add>, %38, %cst_26 [2] : vector<3x16x32xf32> to vector<3x16xf32>
    %40 = vector.shape_cast %39 : vector<3x16xf32> to vector<3x16x1xf32>
    %41 = vector.shape_cast %18 : vector<16x1xf32> to vector<1x16x1xf32>
    %42 = vector.broadcast %41 : vector<1x16x1xf32> to vector<3x16x1xf32>
    %43 = arith.addf %42, %37 : vector<3x16x1xf32>
    %44 = vector.shape_cast %21 : vector<16x1xf32> to vector<1x16x1xf32>
    %45 = vector.broadcast %44 : vector<1x16x1xf32> to vector<3x16x1xf32>
    %46 = arith.addf %45, %40 : vector<3x16x1xf32>
    %cst_27 = arith.constant 1.000000e-24 : f32
    %47 = vector.broadcast %cst_27 : f32 to vector<3x16x1xf32>
    %48 = arith.maximumf %46, %47 : vector<3x16x1xf32>
    %49 = math.rsqrt %48 : vector<3x16x1xf32>
    %50 = arith.mulf %43, %49 : vector<3x16x1xf32>
    %cst_28 = arith.constant dense<0xFF800000> : vector<16x1xf32>
    %51 = vector.multi_reduction <maximumf>, %50, %cst_28 [0] : vector<3x16x1xf32> to vector<16x1xf32>
    %52 = vector.shape_cast %51 : vector<16x1xf32> to vector<1x16x1xf32>
    %53 = vector.broadcast %52 : vector<1x16x1xf32> to vector<3x16x1xf32>
    %54 = arith.subf %50, %53 : vector<3x16x1xf32>
    %55 = math.exp %54 : vector<3x16x1xf32>
    %cst_29 = arith.constant dense<0.000000e+00> : vector<16x1xf32>
    %56 = vector.multi_reduction <add>, %55, %cst_29 [0] : vector<3x16x1xf32> to vector<16x1xf32>
    %57 = vector.shape_cast %56 : vector<16x1xf32> to vector<1x16x1xf32>
    %cst_30 = arith.constant 1.000000e+00 : f32
    %58 = vector.broadcast %cst_30 : f32 to vector<1x16x1xf32>
    %59 = arith.divf %58, %57 : vector<1x16x1xf32>
    %60 = vector.broadcast %59 : vector<1x16x1xf32> to vector<3x16x1xf32>
    %61 = arith.mulf %55, %60 : vector<3x16x1xf32>
    %62 = vector.broadcast %61 : vector<3x16x1xf32> to vector<3x16x32xf32>
    %63 = arith.mulf %32, %62 : vector<3x16x32xf32>
    %cst_31 = arith.constant dense<0.000000e+00> : vector<16x32xf32>
    %64 = vector.multi_reduction <add>, %63, %cst_31 [0] : vector<3x16x32xf32> to vector<16x32xf32>
    %65 = arith.addf %5, %64 : vector<16x32xf32>
    %cst_32 = arith.constant 5.000000e-01 : f32
    %66 = vector.broadcast %cst_32 : f32 to vector<16x32xf32>
    %67 = arith.mulf %65, %66 : vector<16x32xf32>
    %cst_33 = arith.constant 0.000000e+00 : f32
    %68 = vector.broadcast %cst_33 : f32 to vector<16x32xf32>
    %69 = arith.cmpf ogt, %67, %68 : vector<16x32xf32>
    %cst_34 = arith.constant 0.000000e+00 : f32
    %70 = vector.broadcast %cst_34 : f32 to vector<16x32xf32>
    %71 = arith.minimumf %67, %70 : vector<16x32xf32>
    %72 = math.exp %71 : vector<16x32xf32>
    %cst_35 = arith.constant 1.000000e+00 : f32
    %73 = vector.broadcast %cst_35 : f32 to vector<16x32xf32>
    %74 = arith.subf %72, %73 : vector<16x32xf32>
    %75 = arith.select %69, %67, %74 : vector<16x32xi1>, vector<16x32xf32>
    %c0_36 = arith.constant 0 : index
    %c0_37 = arith.constant 0 : index
    %76 = vector.load %arg9[%c0_36, %c0_37] : memref<16x64xf32, #tpu.memory_space<vmem>>, vector<16x32xf32>
    tpu.vector_store %arg9[%c0_36, %c0_37], %75 {strides = array<i32>} : memref<16x64xf32, #tpu.memory_space<vmem>>, vector<16x32xf32>,
    %cst_38 = arith.constant 0.000000e+00 : f32
    %77 = vector.broadcast %cst_38 : f32 to vector<16x32xf32>
    %78 = arith.cmpf ogt, %7, %77 : vector<16x32xf32>
    %cst_39 = arith.constant 0.000000e+00 : f32
    %79 = vector.broadcast %cst_39 : f32 to vector<16x32xf32>
    %80 = arith.minimumf %7, %79 : vector<16x32xf32>
    %81 = math.exp %80 : vector<16x32xf32>
    %cst_40 = arith.constant 1.000000e+00 : f32
    %82 = vector.broadcast %cst_40 : f32 to vector<16x32xf32>
    %83 = arith.subf %81, %82 : vector<16x32xf32>
    %84 = arith.select %78, %7, %83 : vector<16x32xi1>, vector<16x32xf32>
    %c0_41 = arith.constant 0 : index
    %c32 = arith.constant 32 : index
    %85 = vector.load %arg9[%c0_41, %c32] : memref<16x64xf32, #tpu.memory_space<vmem>>, vector<16x32xf32>
    tpu.vector_store %arg9[%c0_41, %c32], %84 {strides = array<i32>} : memref<16x64xf32, #tpu.memory_space<vmem>>, vector<16x32xf32>,
    return
  }
  func.func @transform_0(%arg0: i32) -> (i32, i32) {
    %c0_i32 = arith.constant 0 : i32
    %c0_i32_0 = arith.constant 0 : i32
    return %arg0, %c0_i32 : i32, i32
  }
  func.func @transform_1(%arg0: i32) -> (i32, i32) {
    %c0_i32 = arith.constant 0 : i32
    %c0_i32_0 = arith.constant 0 : i32
    return %arg0, %c0_i32 : i32, i32
  }
  func.func @transform_2(%arg0: i32) -> (i32, i32) {
    %c0_i32 = arith.constant 0 : i32
    %c0_i32_0 = arith.constant 0 : i32
    %c0_i32_1 = arith.constant 0 : i32
    return %c0_i32, %c0_i32_0 : i32, i32
  }
  func.func @transform_3(%arg0: i32) -> (i32, i32, i32) {
    %c0_i32 = arith.constant 0 : i32
    %c0_i32_0 = arith.constant 0 : i32
    %c0_i32_1 = arith.constant 0 : i32
    return %c0_i32, %arg0, %c0_i32_0 : i32, i32, i32
  }
  func.func @transform_4(%arg0: i32) -> (i32, i32) {
    %c0_i32 = arith.constant 0 : i32
    %c0_i32_0 = arith.constant 0 : i32
    %c0_i32_1 = arith.constant 0 : i32
    return %c0_i32, %c0_i32_0 : i32, i32
  }
  func.func @transform_5(%arg0: i32) -> (i32, i32) {
    %c0_i32 = arith.constant 0 : i32
    %c0_i32_0 = arith.constant 0 : i32
    %c0_i32_1 = arith.constant 0 : i32
    return %c0_i32, %c0_i32_0 : i32, i32
  }
  func.func @transform_6(%arg0: i32) -> (i32, i32) {
    %c0_i32 = arith.constant 0 : i32
    %c0_i32_0 = arith.constant 0 : i32
    %c0_i32_1 = arith.constant 0 : i32
    return %c0_i32, %c0_i32_0 : i32, i32
  }
  func.func @transform_7(%arg0: i32) -> (i32, i32) {
    %c0_i32 = arith.constant 0 : i32
    %c0_i32_0 = arith.constant 0 : i32
    %c0_i32_1 = arith.constant 0 : i32
    return %c0_i32, %c0_i32_0 : i32, i32
  }
  func.func @transform_8(%arg0: i32) -> (i32, i32) {
    %c0_i32 = arith.constant 0 : i32
    %c0_i32_0 = arith.constant 0 : i32
    return %arg0, %c0_i32 : i32, i32
  }
}

</mosaic_0001>

<bundles_post_ra>
// kernel: tpu_custom_call.1
= control target key start
LH: loop header
LB: loop body
LE: loop exit
PB: predicated region body
PF: predicated region fallthrough
CT: control target
= control target key end

     0   :  { %13 = vsyncpa [#allocation3], 0  ;;  %s1328_s0 = inlined_call_operand.hbm [shape: f32[16,32], index: 0, kind: input, shape index: {}]   ;;  %s1329_s1 = inlined_call_operand.hbm [shape: f32[16,32], index: 1, kind: input, shape index: {}]   ;;  %s1330_s2 = inlined_call_operand.hbm [shape: f32[17,32], index: 2, kind: input, shape index: {}]   ;;  %s1331_s3 = inlined_call_operand.hbm [shape: bf16[3,16,17], index: 3, kind: input, shape index: {}]   ;;  %s1332_s4 = inlined_call_operand.hbm [shape: f32[32,32], index: 4, kind: input, shape index: {}]   ;;  %s1333_s5 = inlined_call_operand.hbm [shape: f32[32,32], index: 5, kind: input, shape index: {}]   ;;  %s1334_s6 = inlined_call_operand.vmem [shape: f32[1,32], index: 6, kind: input, shape index: {}]   ;;  %s1335_s7 = inlined_call_operand.vmem [shape: f32[1,32], index: 7, kind: input, shape index: {}]   ;;  %s1336_s8 = inlined_call_operand.hbm [shape: f32[16,64], index: 8, kind: output, shape index: {}]  }
   0x1   :  { %14 = vsyncpa [#allocation6], 0 }
   0x2   :  { %15 = vsyncpa [#allocation9], 0 }
   0x3   :  { %16 = vsyncpa [#allocation12], 0 }
   0x4   :  { %17 = vsyncpa [#allocation4], 0  ;;  %s1114_s27 = smov [#allocation5]   ;;  %s1115_s29 = smov [#allocation8]  }
   0x5   :  { %s35_s28 = sshll.u32 %s1114_s27, 4  ;;  %s59_s30 = sshll.u32 %s1115_s29, 4  ;;  %s36_s28 = int_to_ptr.vmem [resolvable:$true] %s35_s28  ;;  %s60_s30 = int_to_ptr.vmem [resolvable:$true] %s59_s30 }
   0x6   :  { %s972_s9 = scalar_lea.vmem %s36_s28, 256  ;;  %p977_p1 = scmp.lt.s32.totalorder %s36_s28, %s36_s28 }
   0x7   :  { %p973_p0 = scmp.ne.s32.totalorder %s36_s28, %s972_s9  ;;  %p978_p2 = scmp.lt.s32.totalorder %s972_s9, %s972_s9 }
   0x9   :  { %p979_p3 = por %p978_p2, %p977_p1 }
   0xb   :  { %p980_p4 = pnand %p979_p3, %p973_p0 }
   0xd   :  { %983 = shalt.err (!%p980_p4)
}
   0xe   :  { %s1116_s10 = smov 128   ;;  %s1117_s11 = smov 8  }
   0xf   :  { %41 = dma.hbm_to_vmem [thread:$0]  %s1329_s1, 256, %s36_s28, [#allocation6], %s1116_s10, %s1116_s10, %s1117_s11  }
  0x10   :  { %s992_s14 = scalar_lea.vmem %s60_s30, 384  ;;  %p997_p6 = scmp.lt.s32.totalorder %s60_s30, %s60_s30 }
  0x11   :  { %p993_p5 = scmp.ne.s32.totalorder %s60_s30, %s992_s14  ;;  %p998_p7 = scmp.lt.s32.totalorder %s992_s14, %s992_s14 }
  0x13   :  { %p999_p8 = por %p998_p7, %p997_p6 }
  0x15   :  { %p1000_p9 = pnand %p999_p8, %p993_p5 }
  0x17   :  { %1003 = shalt.err (!%p1000_p9)
}
  0x18   :  { %s1118_s15 = smov 64   ;;  %s1119_s16 = smov 4  }
  0x19   :  { %65 = dma.hbm_to_vmem [thread:$0]  %s1331_s3, 384, %s60_s30, [#allocation9], %s1118_s15, %s1118_s15, %s1119_s16  }
  0x1a   :  { %s1120_s19 = smov [#allocation2]   ;;  %s1121_s21 = smov [#allocation7]  }
  0x1b   :  { %s23_s20 = sshll.u32 %s1120_s19, 4  ;;  %s47_s22 = sshll.u32 %s1121_s21, 4  ;;  %s24_s20 = int_to_ptr.vmem [resolvable:$true] %s23_s20  ;;  %s48_s22 = int_to_ptr.vmem [resolvable:$true] %s47_s22 }
  0x1c   :  { %s1012_s1 = scalar_lea.vmem %s24_s20, 256  ;;  %p1017_p11 = scmp.lt.s32.totalorder %s24_s20, %s24_s20 }
  0x1d   :  { %p1013_p10 = scmp.ne.s32.totalorder %s24_s20, %s1012_s1  ;;  %p1018_p12 = scmp.lt.s32.totalorder %s1012_s1, %s1012_s1 }
  0x1f   :  { %p1019_p13 = por %p1018_p12, %p1017_p11 }
  0x21   :  { %p1020_p0 = pnand %p1019_p13, %p1013_p10 }
  0x23   :  { %1023 = shalt.err (!%p1020_p0)
}
  0x24   :  { %29 = dma.hbm_to_vmem [thread:$0]  %s1328_s0, 256, %s24_s20, [#allocation3], %s1116_s10, %s1116_s10, %s1117_s11  }
  0x25   :  { %s1032_s3 = scalar_lea.vmem %s48_s22, 384  ;;  %p1037_p2 = scmp.lt.s32.totalorder %s48_s22, %s48_s22 }
  0x26   :  { %p1033_p1 = scmp.ne.s32.totalorder %s48_s22, %s1032_s3  ;;  %p1038_p3 = scmp.lt.s32.totalorder %s1032_s3, %s1032_s3 }
  0x28   :  { %p1039_p4 = por %p1038_p3, %p1037_p2 }
  0x2a   :  { %p1040_p5 = pnand %p1039_p4, %p1033_p1 }
  0x2c   :  { %1043 = shalt.err (!%p1040_p5)
}
  0x2d   :  { %53 = dma.hbm_to_vmem [thread:$0]  %s1330_s2, 384, %s48_s22, [#allocation6], %s1116_s10, %s1116_s10, %s1117_s11  }
  0x2e   :  { %s1122_s27 = smov [#allocation10]   ;;  %s1123_s29 = smov [#allocation11]  }
  0x2f   :  { %s71_s28 = sshll.u32 %s1122_s27, 4  ;;  %s83_s30 = sshll.u32 %s1123_s29, 4  ;;  %s72_s28 = int_to_ptr.vmem [resolvable:$true] %s71_s28  ;;  %s84_s30 = int_to_ptr.vmem [resolvable:$true] %s83_s30 }
  0x30   :  { %s1052_s0 = scalar_lea.vmem %s72_s28, 512  ;;  %p1057_p7 = scmp.lt.s32.totalorder %s72_s28, %s72_s28 }
  0x31   :  { %p1053_p6 = scmp.ne.s32.totalorder %s72_s28, %s1052_s0  ;;  %p1058_p8 = scmp.lt.s32.totalorder %s1052_s0, %s1052_s0 }
  0x33   :  { %p1059_p9 = por %p1058_p8, %p1057_p7 }
  0x35   :  { %p1060_p10 = pnand %p1059_p9, %p1053_p6 }
  0x37   :  { %1063 = shalt.err (!%p1060_p10)
}
  0x38   :  { %77 = dma.hbm_to_vmem [thread:$0]  %s1332_s4, 512, %s72_s28, [#allocation9], %s1116_s10, %s1116_s10, %s1117_s11  }
  0x39   :  { %s1072_s2 = scalar_lea.vmem %s84_s30, 512  ;;  %p1077_p12 = scmp.lt.s32.totalorder %s84_s30, %s84_s30 }
  0x3a   :  { %p1073_p11 = scmp.ne.s32.totalorder %s84_s30, %s1072_s2  ;;  %p1078_p13 = scmp.lt.s32.totalorder %s1072_s2, %s1072_s2 }
  0x3c   :  { %p1079_p0 = por %p1078_p13, %p1077_p12 }
  0x3e   :  { %p1080_p1 = pnand %p1079_p0, %p1073_p11 }
  0x40   :  { %1083 = shalt.err (!%p1080_p1)
}
  0x41   :  { %89 = dma.hbm_to_vmem [thread:$0]  %s1333_s5, 512, %s84_s30, [#allocation12], %s1116_s10, %s1116_s10, %s1117_s11  }
  0x42   :  { %1104 = dma.done.wait [#allocation3], 256  }
  0x43   :  { %1105 = vsyncadd [#allocation3], 4294967040 }
  0x44   :  { %1106 = dma.done.wait [#allocation6], 640  }
  0x45   :  { %1107 = vsyncadd [#allocation6], 4294966656 }
  0x46   :  { %1108 = dma.done.wait [#allocation9], 896  }
  0x47   :  { %1109 = vsyncadd [#allocation9], 4294966400 }
  0x48   :  { %1110 = dma.done.wait [#allocation12], 512  }
  0x49   :  { %1111 = vsyncadd [#allocation12], 4294966784  ;;  %v1124_v0 = vmov 0.0   ;;  %vm1125_vm0 = vmmov 0   ;;  %v122_v1 = vld [vmem:[#allocation10 + $0x18] sm:$0xff]  ;;  %v121_v2 = vld [vmem:[#allocation10 + $0x10] sm:$0xff] }
  0x4a   :  { %894 = vmatprep.subr.mxu1 %v1124_v0  ;;  %862 = vmatprep.mubr.msk.f32.mxu1 %vm1125_vm0, %v1124_v0  ;;  %v120_v3 = vld [vmem:[#allocation10 + $0x8] sm:$0xff]  ;;  %v1207_v4 = vld [vmem:[#allocation8 + $0x10] sm:$0xff]   ;;  %v119_v5 = vld [vmem:[#allocation10] sm:$0xff]  ;;  %vm127_vm1 = vcmask 261120   ;;  %vm391_vm2 = vcmask 138240   ;;  %vm410_vm3 = vcmask 1040384  }
  0x4b   :  { %840 = vmatprep.subr.mxu0 %v122_v1  ;;  %898 = vmatpush3.msra.mxu1 %v122_v1  ;;  %v1209_v6 = vld [vmem:[#allocation8] sm:$0xff]   ;;  %v112_v7 = vld [vmem:[#allocation2] sm:$0xff]  ;;  %v808_v8 = vunpack.c.l.bf16 %v1207_v4  ;;  %v117_v9 = vld [vmem:[#allocation7 + $0x8] sm:$0xff]  ;;  %v809_v13 = vunpack.c.h.bf16 %v1207_v4  ;;  %vm755_vm13 = vcmask 523520  }
  0x4c   :  { %841 = vmatpush3.msra.mxu0 %v122_v1  ;;  %895 = vmatprep.subr.mxu1 %v1124_v0  ;;  %v113_v10 = vld [vmem:[#allocation2 + $0x8] sm:$0xff]  ;;  %v800_v11 = vunpack.c.l.bf16 %v1209_v6  ;;  %v118_v14 = vld [vmem:[#allocation7 + $0x10] sm:$0x1]  ;;  %v801_v16 = vunpack.c.h.bf16 %v1209_v6  ;;  %v116_v18 = vld [vmem:[#allocation7] sm:$0xff] }
  0x4d   :  { %842 = vmatprep.subr.mxu0 %v121_v2  ;;  %899 = vmatpush3.msra.mxu1 %v121_v2  ;;  %v545_v12 = vsel %vm391_vm2, %v808_v8, 0.0  ;;  %v548_v17 = vsel %vm391_vm2, %v809_v13, 0.0  ;;  %v810_v20 = vld [vmem:[#allocation8 + $0x8] sm:$0xff]   ;;  %v126_v25 = vld [vmem:[#allocation11 + $0x18] sm:$0xff]  ;;  %v114_v27 = vld [vmem:[#allocation5] sm:$0xff] }
  0x4e   :  { %843 = vmatpush3.msra.mxu0 %v121_v2  ;;  %896 = vmatprep.subr.mxu1 %v1124_v0  ;;  %v533_v15 = vsel %vm391_vm2, %v800_v11, 0.0  ;;  %v536_v19 = vsel %vm391_vm2, %v801_v16, 0.0  ;;  %v805_v21 = vunpack.c.h.bf16 %v810_v20  ;;  %v804_v22 = vunpack.c.l.bf16 %v810_v20  ;;  %v125_v26 = vld [vmem:[#allocation11 + $0x10] sm:$0xff]  ;;  %v124_v28 = vld [vmem:[#allocation11 + $0x8] sm:$0xff]  ;;  %v123_v29 = vld [vmem:[#allocation11] sm:$0xff] }
  0x4f   :  { %844 = vmatprep.subr.mxu0 %v120_v3  ;;  %900 = vmatpush3.msra.mxu1 %v120_v3  ;;  %v115_v30 = vld [vmem:[#allocation5 + $0x8] sm:$0xff] }
  0x50   :  { %845 = vmatpush3.msra.mxu0 %v120_v3  ;;  %897 = vmatprep.subr.mxu1 %v1124_v0  ;;  %v542_v23 = vsel %vm391_vm2, %v805_v21, 0.0  ;;  %v539_v24 = vsel %vm391_vm2, %v804_v22, 0.0 }
  0x51   :  { %846 = vmatprep.subr.mxu0 %v119_v5  ;;  %901 = vmatpush3.msra.mxu1 %v119_v5 }
  0x52   :  { %847 = vmatpush3.msra.mxu0 %v119_v5  ;;  %848 = vmatprep.mubr.msk.f32.mxu0 %vm127_vm1, %v112_v7 }
  0x53   :  { %863 = vmatmul.mubr.msk.f32.vlgmr.msra.gmra.mxu1 %vm127_vm1, %v117_v9  ;;  %849 = vmatmul.mubr.msk.f32.vlgmr.msra.gmra.mxu0 %vm127_vm1, %v113_v10 }
  0x54   :  { %851 = vmatprep.subr.mxu0 %v1124_v0  ;;  %865 = vmatprep.mubr.msk.f32.mxu1 %vm1125_vm0, %v1124_v0 }
  0x55   :  { %852 = vmatpush3.msra.mxu0 %v122_v1  ;;  %859 = vmatprep.mubr.msk.f32.mxu0 %vm1125_vm0, %v1124_v0 }
  0x56   :  { %853 = vmatprep.subr.mxu0 %v1124_v0  ;;  %546 = vadd.xlane.f32.xlu1 %v545_v12 }
  0x57   :  { %854 = vmatpush3.msra.mxu0 %v121_v2  ;;  %866 = vmatmul.mubr.msk.f32.gmra.mxu1 %vm127_vm1, %v118_v14 }
  0x58   :  { %855 = vmatprep.subr.mxu0 %v1124_v0  ;;  %534 = vadd.xlane.f32.xlu0 %v533_v15 }
  0x59   :  { %856 = vmatpush3.msra.mxu0 %v120_v3  ;;  %885 = vmatprep.mubr.msk.f32.mxu1 %vm391_vm2, %v800_v11 }
  0x5a   :  { %857 = vmatprep.subr.mxu0 %v1124_v0  ;;  %549 = vadd.xlane.f32.xlu1 %v548_v17  ;;  %v792_v17 = vld [vmem:[%s1334_s6] ss:$0 sm:$0xff]  ;;  %s1126_s6 = smov 32  }
  0x5b   :  { %858 = vmatpush3.msra.mxu0 %v119_v5 }
  0x5c   :  { %860 = vmatmul.mubr.msk.f32.vlgmr.msra.gmra.mxu0 %vm127_vm1, %v116_v18  ;;  %537 = vadd.xlane.f32.xlu0 %v536_v19 }
  0x5d   :  { %868 = vmatprep.subr.mxu0 %v126_v25  ;;  %876 = vmatprep.mubr.msk.f32.mxu0 %vm127_vm1, %v114_v27 }
  0x5e   :  { %543 = vadd.xlane.f32.xlu1 %v542_v23  ;;  %869 = vmatpush3.msra.mxu0 %v126_v25 }
  0x5f   :  { %870 = vmatprep.subr.mxu0 %v125_v26 }
  0x60   :  { %540 = vadd.xlane.f32.xlu0 %v539_v24  ;;  %871 = vmatpush3.msra.mxu0 %v125_v26 }
  0x61   :  { %872 = vmatprep.subr.mxu0 %v124_v28 }
  0x62   :  { %873 = vmatpush3.msra.mxu0 %v124_v28 }
  0x63   :  { %874 = vmatprep.subr.mxu0 %v123_v29 }
  0x64   :  { %875 = vmatpush3.msra.mxu0 %v123_v29 }
  0x65   :  { %877 = vmatmul.mubr.msk.f32.vlgmr.msra.gmra.mxu0 %vm127_vm1, %v115_v30 }
  0xdf   :  { %v547_v44 = vpop.xlane.xlu1 %546 }
  0xe0   :  { %vm555_vm9 = vcmp.eq.f32.partialorder %v547_v44, 0.0 }
  0xe1   :  { %v535_v43 = vpop.xlane.xlu0 %534  ;;  %v561_v54 = vsel %vm555_vm9, 1.0, %v547_v44 }
  0xe2   :  { %vm551_vm5 = vcmp.eq.f32.partialorder %v535_v43, 0.0 }
  0xe3   :  { %v550_v46 = vpop.xlane.xlu1 %549  ;;  %v557_v48 = vsel %vm551_vm5, 1.0, %v535_v43 }
  0xe4   :  { %vm556_vm6 = vcmp.eq.f32.partialorder %v550_v46, 0.0 }
  0xe5   :  { %v538_v45 = vpop.xlane.xlu0 %537  ;;  %v562_v51 = vsel %vm556_vm6, 1.0, %v550_v46 }
  0xe6   :  { %vm552_vm4 = vcmp.eq.f32.partialorder %v538_v45, 0.0 }
  0xe7   :  { %v558_v47 = vsel %vm552_vm4, 1.0, %v538_v45  ;;  %v544_v49 = vpop.xlane.xlu1 %543 }
  0xe8   :  { %916 = vrcp.f32 %v558_v47  ;;  %vm554_vm7 = vcmp.eq.f32.partialorder %v544_v49, 0.0 }
  0xe9   :  { %918 = vrcp.f32 %v557_v48  ;;  %v541_v50 = vpop.xlane.xlu0 %540  ;;  %v560_v52 = vsel %vm554_vm7, 1.0, %v544_v49 }
  0xea   :  { %vm553_vm8 = vcmp.eq.f32.partialorder %v541_v50, 0.0  ;;  %920 = vrcp.f32 %v562_v51 }
  0xeb   :  { %v559_v53 = vsel %vm553_vm8, 1.0, %v541_v50  ;;  %922 = vrcp.f32 %v560_v52 }
  0xec   :  { %924 = vrcp.f32 %v559_v53 }
  0xed   :  { %926 = vrcp.f32 %v561_v54 }
  0xf5   :  { %v917_v55 = vpop.eup %916 }
  0xf6   :  { %v919_v56 = vpop.eup %918 }
  0xf7   :  { %v921_v63 = vpop.eup %920 }
  0xf8   :  { %v923_v2 = vpop.eup %922 }
  0xf9   :  { %v925_v5 = vpop.eup %924 }
  0xfa   :  { %v927_v9 = vpop.eup %926 }
 0x113   :  { %v289_v31 = vpop.f32.mrf.mxu1  ;;  %v1235_v32 = vpop.f32.mrf.mxu0 }
 0x114   :  { %v526_v33 = vmul.f32 %v1235_v32, %v1235_v32 }
 0x115   :  { %v864_v34 = vpop.f32.mrf.mxu1  ;;  %v1239_v35 = vpop.f32.mrf.mxu0 }
 0x116   :  { %v530_v36 = vsel %vm127_vm1, %v526_v33, 0.0  ;;  %v525_v37 = vmul.f32 %v1239_v35, %v1239_v35  ;;  %v517_v24 = vmul.f32 %v792_v17, %v1239_v35 }
 0x117   :  { %v294_v38 = vpop.f32.mrf.mxu1  ;;  %531 = vadd.xlane.f32.xlu1 %v530_v36 }
 0x118   :  { %879 = vmatprep.subr.msk.mxu1 %vm410_vm3, %v294_v38  ;;  %v527_v39 = vsel %vm127_vm1, %v525_v37, 0.0  ;;  %v519_v29 = vsel %vm127_vm1, %v517_v24, 0.0 }
 0x119   :  { %v867_v40 = vpop.f32.mrf.mxu1  ;;  %880 = vmatpush3.msk.msra.mxu1 %vm410_vm3, %v294_v38  ;;  %528 = vadd.xlane.f32.xlu0 %v527_v39 }
 0x11a   :  { %881 = vmatprep.subr.mxu1 %v289_v31 }
 0x11b   :  { %882 = vmatpush3.msra.mxu1 %v289_v31 }
 0x11c   :  { %v284_v41 = vpop.f32.mrf.mxu0 }
 0x11d   :  { %883 = vmatprep.subr.mxu1 %v284_v41 }
 0x11e   :  { %v861_v42 = vpop.f32.mrf.mxu0  ;;  %884 = vmatpush3.msra.mxu1 %v284_v41 }
 0x11f   :  { %886 = vmatmul.mubr.msk.f32.vlgmr.msra.gmra.mxu1 %vm391_vm2, %v801_v16 }
 0x120   :  { %888 = vmatprep.mubr.msk.f32.mxu1 %vm391_vm2, %v804_v22  ;;  %v793_v22 = vld [vmem:[%s1335_s7] ss:$0 sm:$0xff]  ;;  %s1127_s7 = smov [#allocation13]  }
 0x121   :  { %s763_s17 = sshll.u32 %s1127_s7, 4  ;;  %s764_s17 = int_to_ptr.vmem [resolvable:$true] %s763_s17 }
 0x122   :  { %s1084_s18 = scalar_lea.vmem %s764_s17, 256  ;;  %p1089_p3 = scmp.lt.s32.totalorder %s764_s17, %s764_s17 }
 0x123   :  { %889 = vmatmul.mubr.msk.f32.gmra.mxu1 %vm391_vm2, %v805_v21  ;;  %v518_v21 = vmul.f32 %v1235_v32, %v792_v17  ;;  %p1085_p2 = scmp.ne.s32.totalorder %s764_s17, %s1084_s18  ;;  %p1090_p4 = scmp.lt.s32.totalorder %s1084_s18, %s1084_s18 }
 0x124   :  { %891 = vmatprep.mubr.msk.f32.mxu1 %vm391_vm2, %v808_v8 }
 0x125   :  { %v878_v25 = vpop.f32.mrf.mxu0  ;;  %v522_v27 = vsel %vm127_vm1, %v518_v21, 0.0  ;;  %p1091_p5 = por %p1090_p4, %p1089_p3 }
 0x126   :  { %v738_v26 = vmin.f32 %v878_v25, 0.0  ;;  %vm736_vm10 = vcmp.gt.f32.partialorder %v878_v25, 0.0 }
 0x127   :  { %892 = vmatmul.mubr.msk.f32.gmra.mxu1 %vm391_vm2, %v809_v13  ;;  %v370_v33 = vpop.f32.mrf.mxu0  ;;  %p1092_p6 = pnand %p1091_p5, %p1085_p2 }
 0x128   :  { %v741_v31 = vmul.f32 1.442695, %v738_v26  ;;  %v737_v39 = vmin.f32 %v370_v33, 0.0  ;;  %vm735_vm11 = vcmp.gt.f32.partialorder %v370_v33, 0.0 }
 0x12a   :  { %928 = vpow2.f32 %v741_v31  ;;  %v739_v44 = vmul.f32 1.442695, %v737_v39 }
 0x12c   :  { %930 = vpow2.f32 %v739_v44 }
 0x137   :  { %v929_v47 = vpop.eup %928 }
 0x138   :  { %v797_v48 = vadd.f32 -1.0, %v929_v47 }
 0x139   :  { %v931_v49 = vpop.eup %930 }
 0x13a   :  { %v746_v50 = vsel %vm736_vm10, %v878_v25, %v797_v48  ;;  %v796_v51 = vadd.f32 -1.0, %v931_v49 }
 0x13c   :  { %v745_v52 = vsel %vm735_vm11, %v370_v33, %v796_v51 }
 0x1a0   :  { %v532_v53 = vpop.xlane.xlu1 %531 }
 0x1a2   :  { %v529_v54 = vpop.xlane.xlu0 %528 }
 0x1df   :  { %v887_v57 = vpop.f32.mrf.mxu1 }
 0x1e0   :  { %v1254_v58 = vmul.f32 %v917_v55, %v887_v57 }
 0x1e1   :  { %v480_v59 = vpop.f32.mrf.mxu1 }
 0x1e2   :  { %v1256_v60 = vmul.f32 %v919_v56, %v480_v59  ;;  %v612_v61 = vmul.f32 %v1254_v58, %v1254_v58  ;;  %v588_v28 = vmul.f32 %v793_v22, %v1254_v58 }
 0x1e3   :  { %v890_v62 = vpop.f32.mrf.mxu1 }
 0x1e4   :  { %v620_v0 = vsel %vm127_vm1, %v612_v61, 0.0  ;;  %v611_v1 = vmul.f32 %v1256_v60, %v1256_v60  ;;  %v1264_v7 = vmul.f32 %v923_v2, %v890_v62  ;;  %v587_v30 = vmul.f32 %v793_v22, %v1256_v60 }
 0x1e5   :  { %621 = vadd.xlane.f32.xlu1 %v620_v0  ;;  %v490_v3 = vpop.f32.mrf.mxu1  ;;  %v596_v34 = vsel %vm127_vm1, %v588_v28, 0.0 }
 0x1e6   :  { %v617_v4 = vsel %vm127_vm1, %v611_v1, 0.0  ;;  %v1268_v11 = vmul.f32 %v925_v5, %v490_v3  ;;  %v614_v16 = vmul.f32 %v1264_v7, %v1264_v7  ;;  %v593_v37 = vsel %vm127_vm1, %v587_v30, 0.0 }
 0x1e7   :  { %618 = vadd.xlane.f32.xlu0 %v617_v4  ;;  %v893_v6 = vpop.f32.mrf.mxu1  ;;  %v590_v41 = vmul.f32 %v793_v22, %v1264_v7 }
 0x1e8   :  { %v1266_v8 = vmul.f32 %v921_v63, %v893_v6  ;;  %v613_v19 = vmul.f32 %v1268_v11, %v1268_v11  ;;  %v626_v20 = vsel %vm127_vm1, %v614_v16, 0.0  ;;  %v589_v43 = vmul.f32 %v793_v22, %v1268_v11 }
 0x1e9   :  { %v500_v10 = vpop.f32.mrf.mxu1  ;;  %v602_v45 = vsel %vm127_vm1, %v590_v41, 0.0 }
 0x1ea   :  { %v1270_v12 = vmul.f32 %v927_v9, %v500_v10  ;;  %v616_v13 = vmul.f32 %v1266_v8, %v1266_v8  ;;  %v623_v23 = vsel %vm127_vm1, %v613_v19, 0.0  ;;  %v592_v36 = vmul.f32 %v793_v22, %v1266_v8 }
 0x1eb   :  { %v599_v46 = vsel %vm127_vm1, %v589_v43, 0.0 }
 0x1ec   :  { %v632_v14 = vsel %vm127_vm1, %v616_v13, 0.0  ;;  %v615_v15 = vmul.f32 %v1270_v12, %v1270_v12  ;;  %v591_v38 = vmul.f32 %v793_v22, %v1270_v12  ;;  %v608_v40 = vsel %vm127_vm1, %v592_v36, 0.0 }
 0x1ed   :  { %633 = vadd.xlane.f32.xlu1 %v632_v14 }
 0x1ee   :  { %v629_v18 = vsel %vm127_vm1, %v615_v15, 0.0  ;;  %v605_v42 = vsel %vm127_vm1, %v591_v38, 0.0 }
 0x1ef   :  { %630 = vadd.xlane.f32.xlu0 %v629_v18 }
 0x1f1   :  { %627 = vadd.xlane.f32.xlu1 %v626_v20 }
 0x1f3   :  { %624 = vadd.xlane.f32.xlu0 %v623_v23 }
 0x1f5   :  { %523 = vadd.xlane.f32.xlu1 %v522_v27 }
 0x1f7   :  { %520 = vadd.xlane.f32.xlu0 %v519_v29 }
 0x1f9   :  { %597 = vadd.xlane.f32.xlu1 %v596_v34 }
 0x1fb   :  { %594 = vadd.xlane.f32.xlu0 %v593_v37 }
 0x1fd   :  { %609 = vadd.xlane.f32.xlu1 %v608_v40 }
 0x1ff   :  { %606 = vadd.xlane.f32.xlu0 %v605_v42 }
 0x201   :  { %603 = vadd.xlane.f32.xlu1 %v602_v45 }
 0x203   :  { %600 = vadd.xlane.f32.xlu0 %v599_v46 }
 0x212   :  { %751 = vrot.lane.b32.xlu1 %v746_v50, %s1126_s6 }
 0x219   :  { %749 = vrot.lane.b32.xlu0 %v745_v52, %s1126_s6 }
 0x26e   :  { %v622_v55 = vpop.xlane.xlu1 %621 }
 0x26f   :  { %v642_v57 = vadd.f32 %v622_v55, %v532_v53 }
 0x270   :  { %v619_v56 = vpop.xlane.xlu0 %618 }
 0x271   :  { %v641_v59 = vadd.f32 %v619_v56, %v529_v54  ;;  %v648_v63 = vmax.f32 %v642_v57, 1e-24 }
 0x273   :  { %v647_v3 = vmax.f32 %v641_v59, 1e-24 }
 0x276   :  { %v634_v61 = vpop.xlane.xlu1 %633 }
 0x277   :  { %v646_v62 = vadd.f32 %v634_v61, %v532_v53 }
 0x278   :  { %v631_v0 = vpop.xlane.xlu0 %630 }
 0x279   :  { %v652_v1 = vmax.f32 %v646_v62, 1e-24  ;;  %v645_v2 = vadd.f32 %v631_v0, %v529_v54 }
 0x27a   :  { %v628_v4 = vpop.xlane.xlu1 %627 }
 0x27b   :  { %932 = vrsqrt.f32 %v652_v1  ;;  %v651_v5 = vmax.f32 %v645_v2, 1e-24  ;;  %v644_v6 = vadd.f32 %v628_v4, %v532_v53 }
 0x27c   :  { %934 = vrsqrt.f32 %v648_v63  ;;  %v625_v9 = vpop.xlane.xlu0 %624 }
 0x27d   :  { %936 = vrsqrt.f32 %v651_v5  ;;  %v650_v10 = vmax.f32 %v644_v6, 1e-24  ;;  %v643_v13 = vadd.f32 %v625_v9, %v529_v54 }
 0x27e   :  { %938 = vrsqrt.f32 %v647_v3  ;;  %v524_v14 = vpop.xlane.xlu1 %523 }
 0x27f   :  { %940 = vrsqrt.f32 %v650_v10  ;;  %v649_v15 = vmax.f32 %v643_v13, 1e-24 }
 0x280   :  { %v521_v16 = vpop.xlane.xlu0 %520 }
 0x281   :  { %942 = vrsqrt.f32 %v649_v15 }
 0x282   :  { %v598_v17 = vpop.xlane.xlu1 %597 }
 0x283   :  { %v636_v20 = vadd.f32 %v598_v17, %v524_v14 }
 0x284   :  { %v595_v18 = vpop.xlane.xlu0 %594 }
 0x285   :  { %v635_v25 = vadd.f32 %v595_v18, %v521_v16 }
 0x286   :  { %v610_v19 = vpop.xlane.xlu1 %609 }
 0x287   :  { %v640_v21 = vadd.f32 %v610_v19, %v524_v14 }
 0x288   :  { %v933_v22 = vpop.eup %932  ;;  %v607_v23 = vpop.xlane.xlu0 %606 }
 0x289   :  { %v935_v24 = vpop.eup %934  ;;  %v664_v26 = vmul.f32 %v933_v22, %v640_v21  ;;  %v639_v27 = vadd.f32 %v607_v23, %v521_v16 }
 0x28a   :  { %v937_v28 = vpop.eup %936  ;;  %v604_v29 = vpop.xlane.xlu1 %603  ;;  %v660_v31 = vmul.f32 %v935_v24, %v636_v20 }
 0x28b   :  { %v939_v30 = vpop.eup %938  ;;  %v663_v33 = vmul.f32 %v937_v28, %v639_v27  ;;  %v638_v34 = vadd.f32 %v604_v29, %v524_v14 }
 0x28c   :  { %v941_v36 = vpop.eup %940  ;;  %v601_v37 = vpop.xlane.xlu0 %600  ;;  %v659_v38 = vmul.f32 %v939_v30, %v635_v25  ;;  %v667_v39 = vmax.f32 %v660_v31, %v664_v26 }
 0x28d   :  { %v662_v40 = vmul.f32 %v941_v36, %v638_v34  ;;  %v637_v41 = vadd.f32 %v601_v37, %v521_v16 }
 0x28e   :  { %v943_v42 = vpop.eup %942  ;;  %v665_v43 = vmax.f32 %v659_v38, %v663_v33 }
 0x28f   :  { %v668_v44 = vmax.f32 %v667_v39, %v662_v40  ;;  %v661_v45 = vmul.f32 %v943_v42, %v637_v41 }
 0x291   :  { %v670_v46 = vsub.f32 %v660_v31, %v668_v44  ;;  %v672_v47 = vsub.f32 %v662_v40, %v668_v44  ;;  %v674_v48 = vsub.f32 %v664_v26, %v668_v44  ;;  %v666_v49 = vmax.f32 %v665_v43, %v661_v45  ;;  %v750_v44 = vpop.permute.xlu0 %749 }
 0x293   :  { %v677_v50 = vmul.f32 1.442695, %v670_v46  ;;  %v681_v51 = vmul.f32 1.442695, %v672_v47  ;;  %v685_v52 = vmul.f32 1.442695, %v674_v48  ;;  %v669_v53 = vsub.f32 %v659_v38, %v666_v49 }
 0x294   :  { %v671_v54 = vsub.f32 %v661_v45, %v666_v49  ;;  %v673_v55 = vsub.f32 %v663_v33, %v666_v49 }
 0x295   :  { %944 = vpow2.f32 %v677_v50  ;;  %v675_v56 = vmul.f32 1.442695, %v669_v53 }
 0x296   :  { %946 = vpow2.f32 %v681_v51  ;;  %v679_v57 = vmul.f32 1.442695, %v671_v54  ;;  %v683_v59 = vmul.f32 1.442695, %v673_v55 }
 0x297   :  { %948 = vpow2.f32 %v685_v52 }
 0x298   :  { %950 = vpow2.f32 %v675_v56 }
 0x299   :  { %952 = vpow2.f32 %v679_v57 }
 0x29a   :  { %954 = vpow2.f32 %v683_v59 }
 0x2a2   :  { %v945_v61 = vpop.eup %944 }
 0x2a3   :  { %v947_v62 = vpop.eup %946 }
 0x2a4   :  { %v949_v63 = vpop.eup %948  ;;  %v689_v0 = vadd.f32 %v947_v62, %v945_v61 }
 0x2a5   :  { %v951_v1 = vpop.eup %950 }
 0x2a6   :  { %v953_v2 = vpop.eup %952  ;;  %v690_v3 = vadd.f32 %v949_v63, %v689_v0 }
 0x2a7   :  { %v687_v4 = vadd.f32 %v953_v2, %v951_v1  ;;  %v955_v5 = vpop.eup %954 }
 0x2a8   :  { %956 = vrcp.f32 %v690_v3 }
 0x2a9   :  { %v688_v6 = vadd.f32 %v955_v5, %v687_v4 }
 0x2ab   :  { %958 = vrcp.f32 %v688_v6 }
 0x2b5   :  { %v957_v9 = vpop.eup %956 }
 0x2b6   :  { %v698_v10 = vmul.f32 %v957_v9, %v947_v62  ;;  %v696_v13 = vmul.f32 %v957_v9, %v945_v61  ;;  %v700_v14 = vmul.f32 %v957_v9, %v949_v63 }
 0x2b8   :  { %v959_v15 = vpop.eup %958  ;;  %v704_v16 = vmul.f32 %v698_v10, %v1264_v7  ;;  %v702_v17 = vmul.f32 %v696_v13, %v1254_v58  ;;  %v706_v18 = vmul.f32 %v700_v14, %v1266_v8 }
 0x2b9   :  { %v697_v19 = vmul.f32 %v959_v15, %v953_v2  ;;  %v695_v20 = vmul.f32 %v959_v15, %v951_v1  ;;  %v699_v21 = vmul.f32 %v959_v15, %v955_v5 }
 0x2ba   :  { %v712_v22 = vsel %vm127_vm1, %v702_v17, 0.0  ;;  %v713_v23 = vsel %vm127_vm1, %v704_v16, 0.0  ;;  %v715_v7 = vsel %vm127_vm1, %v706_v18, 0.0 }
 0x2bb   :  { %v703_v24 = vmul.f32 %v697_v19, %v1268_v11  ;;  %v701_v25 = vmul.f32 %v695_v20, %v1256_v60  ;;  %v705_v26 = vmul.f32 %v699_v21, %v1270_v12  ;;  %v714_v27 = vadd.f32 %v713_v23, %v712_v22 }
 0x2bd   :  { %v707_v58 = vsel %vm127_vm1, %v701_v25, 0.0  ;;  %v708_v8 = vsel %vm127_vm1, %v703_v24, 0.0  ;;  %v716_v28 = vadd.f32 %v715_v7, %v714_v27  ;;  %v710_v30 = vsel %vm127_vm1, %v705_v26, 0.0 }
 0x2be   :  { %v709_v29 = vadd.f32 %v708_v8, %v707_v58 }
 0x2bf   :  { %v718_v31 = vadd.f32 %v1235_v32, %v716_v28  ;;  %v752_v32 = vpop.permute.xlu1 %751 }
 0x2c0   :  { %v711_v33 = vadd.f32 %v710_v30, %v709_v29 }
 0x2c1   :  { %v720_v34 = vmul.f32 0.5, %v718_v31 }
 0x2c2   :  { %v717_v11 = vadd.f32 %v711_v33, %v1239_v35 }
 0x2c3   :  { %v724_v60 = vmin.f32 %v720_v34, 0.0  ;;  %vm722_vm12 = vcmp.gt.f32.partialorder %v720_v34, 0.0 }
 0x2c4   :  { %v719_v36 = vmul.f32 0.5, %v717_v11 }
 0x2c5   :  { %v727_v12 = vmul.f32 1.442695, %v724_v60 }
 0x2c6   :  { %v723_v37 = vmin.f32 %v719_v36, 0.0  ;;  %vm721_vm14 = vcmp.gt.f32.partialorder %v719_v36, 0.0 }
 0x2c7   :  { %960 = vpow2.f32 %v727_v12 }
 0x2c8   :  { %v725_v38 = vmul.f32 1.442695, %v723_v37 }
 0x2ca   :  { %962 = vpow2.f32 %v725_v38 }
 0x2d4   :  { %v961_v39 = vpop.eup %960 }
 0x2d5   :  { %v795_v40 = vadd.f32 -1.0, %v961_v39 }
 0x2d7   :  { %v963_v41 = vpop.eup %962  ;;  %v732_v42 = vsel %vm722_vm12, %v720_v34, %v795_v40 }
 0x2d8   :  { %v794_v43 = vadd.f32 -1.0, %v963_v41  ;;  %734 = vst.msk [vmem:[#allocation13 + $0x8] sm:$0xff] %vm127_vm1, %v732_v42 }
 0x2d9   :  { %757 = vst.msk [vmem:[#allocation13 + $0x8] sm:$0xff] %vm755_vm13, %v752_v32 }
 0x2da   :  { %v731_v35 = vsel %vm721_vm14, %v719_v36, %v794_v43 }
 0x2db   :  { %733 = vst.msk [vmem:[#allocation13] sm:$0xff] %vm127_vm1, %v731_v35 }
 0x2dc   :  { %756 = vst.msk [vmem:[#allocation13] sm:$0xff] %vm755_vm13, %v750_v44 }
 0x2dd   :  { %1095 = shalt.err (!%p1092_p6)
}
 0x2de   :  { %769 = dma.vmem_to_hbm [thread:$0]  %s764_s17, 256, %s1336_s8, [#allocation4], %s1116_s10, %s1116_s10, %s1117_s11  }
 0x2df   :  { %1112 = dma.done.wait [#allocation4], 256  }
 0x2e0   :  { %1113 = vsyncadd [#allocation4], 4294967040 }
 0x2e1   :  { %773 = vsyncpa [#allocation3], 1 }
 0x2e2   :  { %774 = vsyncpa [#allocation6], 1 }
 0x2e3   :  { %775 = vsyncpa [#allocation9], 1 }
 0x2e4   :  { %776 = vsyncpa [#allocation12], 1 }
 0x2e5   :  { %777 = vsyncpa [#allocation4], 1 }

</bundles_post_ra>
